<compile_context>
chip_gen: v7x
topology: tpu7x:2x2x1
jax: 0.10.0
libtpu: 0.0.40
codegen_flags: <defaults>
</compile_context>

<pallas_src>
import functools

import jax
import jax.numpy as jnp
from jax.experimental import pallas as pl
from jax.experimental.pallas import tpu as pltpu

EPS = 1e-5


def _round_up(v, m):
    return (v + m - 1) // m * m


@functools.lru_cache(maxsize=1)
def _vmem_capacity_bytes():
    """Physical per-core VMEM (generation-aware); conservative 64 MiB fallback."""
    try:
        cap = int(pltpu.get_tpu_info().vmem_capacity_bytes)
        if cap > 0:
            return cap
    except Exception:
        pass
    return 64 << 20


def _vmem_budget(block_bytes):
    """Double-buffered blocks + slack, clamped below physical VMEM."""
    need = 2 * sum(block_bytes) + (2 << 20)
    cap = _vmem_capacity_bytes() - (8 << 20)
    return int(min(max(need, 4 << 20), cap))


# --------------------------------------------------------------------------- #
# Fused decoder kernel: Linear1 + BN(scale/shift) + ReLU + Linear2             #
# --------------------------------------------------------------------------- #
def _decoder_kernel(x_ref, w1_ref, ss_ref, w2_ref, b2_ref, out_ref):
    # h = x_tile @ w1 on the MXU with f32 accumulation (K = m is tiny; the
    # kernel is store-bound, so no K padding).  b1 cancels under BN -> omitted.
    h = jnp.dot(x_ref[...], w1_ref[...], preferred_element_type=jnp.float32)
    hn = jnp.maximum(h * ss_ref[0:1, :] + ss_ref[1:2, :], 0.0)
    out_ref[...] = (
        jnp.dot(hn.astype(w2_ref.dtype), w2_ref[...],
                preferred_element_type=jnp.float32) + b2_ref[...]
    ).astype(out_ref.dtype)


# --------------------------------------------------------------------------- #
# Wrapper                                                                      #
# --------------------------------------------------------------------------- #
@functools.partial(
    jax.jit,
    static_argnames=("tile_rows", "tile_n", "compute_dtype", "out_dtype"))
def vae_decoder_forward(x, params, *, tile_rows=512, tile_n=2048,
                        compute_dtype=jnp.bfloat16, out_dtype=jnp.float32):
    """x: (bs, N, m) -> logits (bs, N, output_dim)."""
    w1 = params["w1"].astype(jnp.float32)
    gamma = params["gamma"].astype(jnp.float32).reshape(1, -1)
    beta = params["beta"].astype(jnp.float32).reshape(1, -1)
    w2, b2 = params["w2"], params["b2"]
    # params["b1"] cancels exactly under training-mode BatchNorm (constant
    # per-channel shift removed by the mean subtraction), so it is unused.

    bs, n_seq, m = x.shape
    hidden = w1.shape[1]
    out_dim = w2.shape[1]
    rows = bs * n_seq

    # ---- BatchNorm statistics via centered Gram identity (plain XLA) --------
    x2d = x.reshape(rows, m).astype(jnp.float32)
    mean_x = jnp.mean(x2d, axis=0, keepdims=True)                  # (1, m)
    xc = x2d - mean_x
    cov_x = (xc.T @ xc) * (1.0 / float(rows))                      # (m, m)
    mean_h = mean_x @ w1                                           # (1, hidden)
    var_h = jnp.sum(w1 * (cov_x @ w1), axis=0, keepdims=True)      # biased var
    scale = gamma * jax.lax.rsqrt(var_h + EPS)
    shift = beta - mean_h * scale
    ss = jnp.concatenate([scale, shift], axis=0)                   # (2, hidden) f32

    # ---- tile geometry (lane- and sublane-aligned; no padding to tile size) -
    rows_pad = _round_up(rows, 8)
    tr = _round_up(min(tile_rows, rows_pad), 8)
    out_pad = _round_up(out_dim, 128)
    tn = _round_up(min(tile_n, out_pad), 128)
    n_row_tiles = pl.cdiv(rows_pad, tr)
    n_out_tiles = pl.cdiv(out_pad, tn)

    # ---- operand preparation -------------------------------------------------
    x_k = x2d
    if rows_pad != rows:
        x_k = jnp.pad(x_k, ((0, rows_pad - rows), (0, 0)))
    x_k = x_k.astype(compute_dtype)            # MXU feed dtype (f32 accumulate)
    w1_k = w1.astype(compute_dtype)

    w2_k = w2.astype(jnp.float32)
    b2_k = b2.astype(jnp.float32)
    if out_pad != out_dim:
        w2_k = jnp.pad(w2_k, ((0, 0), (0, out_pad - out_dim)))
        b2_k = jnp.pad(b2_k, (0, out_pad - out_dim))
    w2_k = w2_k.astype(compute_dtype)
    b2_2d = b2_k.reshape(1, out_pad)           # f32

    c_isz = jnp.dtype(compute_dtype).itemsize
    o_isz = jnp.dtype(out_dtype).itemsize
    vmem = _vmem_budget([
        tr * m * c_isz,            # x row tile
        m * hidden * c_isz,        # w1 (resident)
        2 * hidden * 4,            # scale/shift
        hidden * tn * c_isz,       # w2 column tile
        tn * 4,                    # b2 column tile
        tr * tn * o_isz,           # output tile
    ])

    out2d = pl.pallas_call(
        _decoder_kernel,
        out_shape=jax.ShapeDtypeStruct((rows_pad, out_pad), out_dtype),
        grid_spec=pltpu.PrefetchScalarGridSpec(
            num_scalar_prefetch=0,
            grid=(n_row_tiles, n_out_tiles),
            in_specs=[
                pl.BlockSpec((tr, m), lambda i, j: (i, 0)),        # x row tile
                pl.BlockSpec((m, hidden), lambda i, j: (0, 0)),    # w1
                pl.BlockSpec((2, hidden), lambda i, j: (0, 0)),    # scale/shift
                pl.BlockSpec((hidden, tn), lambda i, j: (0, j)),   # w2 col tile
                pl.BlockSpec((1, tn), lambda i, j: (0, j)),        # b2 col tile
            ],
            out_specs=pl.BlockSpec((tr, tn), lambda i, j: (i, j)),
        ),
        compiler_params=pltpu.CompilerParams(
            # Every (i, j) block is independent -> megacore-shardable on v7x.
            dimension_semantics=("parallel", "parallel"),
            vmem_limit_bytes=vmem),
    )(x_k, w1_k, ss, w2_k, b2_2d)

    if rows_pad != rows or out_pad != out_dim:
        out2d = out2d[:rows, :out_dim]
    return out2d.reshape(bs, n_seq, out_dim)


# --------------------------------------------------------------------------- #
# Parameter init matching the PyTorch module                                   #
# --------------------------------------------------------------------------- #
def init_params(key, input_dim, hidden_dim, output_dim):
    """Linear weights: kaiming_normal_(fan_in, relu) => N(0, sqrt(2/fan_in));
    biases zero; BatchNorm gamma=1, beta=0.  Weights stored as (in, out)."""
    k1, k2 = jax.random.split(key)
    std1 = (2.0 / input_dim) ** 0.5
    std2 = (2.0 / hidden_dim) ** 0.5
    w1 = jax.random.normal(k1, (input_dim, hidden_dim), jnp.float32) * std1
    w2 = jax.random.normal(k2, (hidden_dim, output_dim), jnp.float32) * std2
    return {
        "w1": w1,
        "b1": jnp.zeros((hidden_dim,), jnp.float32),
        "gamma": jnp.ones((hidden_dim,), jnp.float32),
        "beta": jnp.zeros((hidden_dim,), jnp.float32),
        "w2": w2,
        "b2": jnp.zeros((output_dim,), jnp.float32),
    }


def _reference(x, p):
    """Pure-JAX f32 reference of the PyTorch forward (training-mode BN)."""
    bs, n, m = x.shape
    h = x.reshape(bs * n, m) @ p["w1"] + p["b1"]
    mean = jnp.mean(h, axis=0, keepdims=True)
    var = jnp.mean((h - mean) ** 2, axis=0, keepdims=True)
    hn = (h - mean) / jnp.sqrt(var + EPS) * p["gamma"] + p["beta"]
    hn = jnp.maximum(hn, 0.0)
    out = hn @ p["w2"] + p["b2"]
    return out.reshape(bs, n, -1)


if __name__ == "__main__":
    # Small shapes consistent with the module: latent m=4, hidden=32, d=16.
    bs, n_seq = 2, 8
    input_dim, hidden_dim, d = 4, 32, 16
    output_dim = d * d  # 256

    key = jax.random.PRNGKey(0)
    kx, kp = jax.random.split(key)
    x = jax.random.normal(kx, (bs, n_seq, input_dim), jnp.float32)
    params = init_params(kp, input_dim, hidden_dim, output_dim)

    ref = _reference(x, params)

    # f32 compute path: tight check against the pure-JAX reference.
    out_f32 = jax.block_until_ready(
        vae_decoder_forward(x, params, compute_dtype=jnp.float32))
    assert out_f32.shape == (bs, n_seq, output_dim)
    assert jnp.allclose(out_f32, ref, atol=1e-4, rtol=1e-4)

    # bf16 MXU-feed path (default, faster on v5e/v6e/v7x): loose check.
    out_bf16 = jax.block_until_ready(vae_decoder_forward(x, params))
    assert out_bf16.shape == (bs, n_seq, output_dim)
    assert jnp.allclose(out_bf16, ref, atol=5e-2, rtol=5e-2)

    print("KERNEL_OK")
</pallas_src>

<mosaic_0001>
module attributes {stable_mosaic.version = 11 : i64} {
  func.func @_decoder_kernel(%arg0: i32, %arg1: i32, %arg2: memref<16x4xf32, #tpu.memory_space<vmem>>, %arg3: memref<4x32xf32, #tpu.memory_space<vmem>>, %arg4: memref<2x32xf32, #tpu.memory_space<vmem>>, %arg5: memref<32x256xf32, #tpu.memory_space<vmem>>, %arg6: memref<1x256xf32, #tpu.memory_space<vmem>>, %arg7: memref<16x256xf32, #tpu.memory_space<vmem>>) attributes {dimension_semantics = [#tpu.dimension_semantics<parallel>, #tpu.dimension_semantics<parallel>], iteration_bounds = array<i64: 1, 1>, scalar_prefetch = 0 : i64, scratch_operands = 0 : i64, tpu.core_type = #tpu.core_type<tc>, window_params = [{transform_indices = @transform_0, window_bounds = array<i64: 16, 4>}, {pipeline_mode = #tpu.pipeline_mode<synchronous>, transform_indices = @transform_1, window_bounds = array<i64: 4, 32>}, {pipeline_mode = #tpu.pipeline_mode<synchronous>, transform_indices = @transform_2, window_bounds = array<i64: 2, 32>}, {transform_indices = @transform_3, window_bounds = array<i64: 32, 256>}, {transform_indices = @transform_4, window_bounds = array<i64: 1, 256>}, {transform_indices = @transform_5, window_bounds = array<i64: 16, 256>}]} {
    %c0 = arith.constant 0 : index
    %c0_0 = arith.constant 0 : index
    %0 = vector.load %arg2[%c0, %c0_0] : memref<16x4xf32, #tpu.memory_space<vmem>>, vector<16x4xf32>
    %c0_1 = arith.constant 0 : index
    %c0_2 = arith.constant 0 : index
    %1 = vector.load %arg3[%c0_1, %c0_2] : memref<4x32xf32, #tpu.memory_space<vmem>>, vector<4x32xf32>
    %cst = arith.constant dense<0.000000e+00> : vector<16x32xf32>
    %2 = tpu.matmul %0, %1, %cst {dimension_numbers = #tpu.dot_dimension_numbers<[1], [0], [0], [1], [0, 0, 1, 1], [], []>} : vector<16x4xf32>, vector<4x32xf32>, vector<16x32xf32> -> vector<16x32xf32>
    %c0_3 = arith.constant 0 : index
    %c0_4 = arith.constant 0 : index
    %3 = vector.load %arg4[%c0_3, %c0_4] : memref<2x32xf32, #tpu.memory_space<vmem>>, vector<1x32xf32>
    %4 = vector.broadcast %3 : vector<1x32xf32> to vector<16x32xf32>
    %5 = arith.mulf %2, %4 : vector<16x32xf32>
    %c1 = arith.constant 1 : index
    %c0_5 = arith.constant 0 : index
    %6 = vector.load %arg4[%c1, %c0_5] : memref<2x32xf32, #tpu.memory_space<vmem>>, vector<1x32xf32>
    %7 = vector.broadcast %6 : vector<1x32xf32> to vector<16x32xf32>
    %8 = arith.addf %5, %7 : vector<16x32xf32>
    %cst_6 = arith.constant 0.000000e+00 : f32
    %9 = vector.broadcast %cst_6 : f32 to vector<16x32xf32>
    %10 = arith.maximumf %8, %9 : vector<16x32xf32>
    %c0_7 = arith.constant 0 : index
    %c0_8 = arith.constant 0 : index
    %11 = vector.load %arg5[%c0_7, %c0_8] : memref<32x256xf32, #tpu.memory_space<vmem>>, vector<32x256xf32>
    %cst_9 = arith.constant dense<0.000000e+00> : vector<16x256xf32>
    %12 = tpu.matmul %10, %11, %cst_9 {dimension_numbers = #tpu.dot_dimension_numbers<[1], [0], [0], [1], [0, 0, 1, 1], [], []>} : vector<16x32xf32>, vector<32x256xf32>, vector<16x256xf32> -> vector<16x256xf32>
    %c0_10 = arith.constant 0 : index
    %c0_11 = arith.constant 0 : index
    %13 = vector.load %arg6[%c0_10, %c0_11] : memref<1x256xf32, #tpu.memory_space<vmem>>, vector<1x256xf32>
    %14 = vector.broadcast %13 : vector<1x256xf32> to vector<16x256xf32>
    %15 = arith.addf %12, %14 : vector<16x256xf32>
    %c0_12 = arith.constant 0 : index
    %c0_13 = arith.constant 0 : index
    %16 = vector.load %arg7[%c0_12, %c0_13] : memref<16x256xf32, #tpu.memory_space<vmem>>, vector<16x256xf32>
    tpu.vector_store %arg7[%c0_12, %c0_13], %15 {strides = array<i32>} : memref<16x256xf32, #tpu.memory_space<vmem>>, vector<16x256xf32>,
    return
  }
  func.func @transform_0(%arg0: i32, %arg1: i32) -> (i32, i32) {
    %c0_i32 = arith.constant 0 : i32
    %c0_i32_0 = arith.constant 0 : i32
    return %arg0, %c0_i32 : i32, i32
  }
  func.func @transform_1(%arg0: i32, %arg1: i32) -> (i32, i32) {
    %c0_i32 = arith.constant 0 : i32
    %c0_i32_0 = arith.constant 0 : i32
    %c0_i32_1 = arith.constant 0 : i32
    return %c0_i32, %c0_i32_0 : i32, i32
  }
  func.func @transform_2(%arg0: i32, %arg1: i32) -> (i32, i32) {
    %c0_i32 = arith.constant 0 : i32
    %c0_i32_0 = arith.constant 0 : i32
    %c0_i32_1 = arith.constant 0 : i32
    return %c0_i32, %c0_i32_0 : i32, i32
  }
  func.func @transform_3(%arg0: i32, %arg1: i32) -> (i32, i32) {
    %c0_i32 = arith.constant 0 : i32
    %c0_i32_0 = arith.constant 0 : i32
    return %c0_i32, %arg1 : i32, i32
  }
  func.func @transform_4(%arg0: i32, %arg1: i32) -> (i32, i32) {
    %c0_i32 = arith.constant 0 : i32
    %c0_i32_0 = arith.constant 0 : i32
    return %c0_i32, %arg1 : i32, i32
  }
  func.func @transform_5(%arg0: i32, %arg1: i32) -> (i32, i32) {
    %c0_i32 = arith.constant 0 : i32
    return %arg0, %arg1 : i32, i32
  }
}

</mosaic_0001>

<bundles_post_ra>
// kernel: vae_decoder_forward.1
= control target key start
LH: loop header
LB: loop body
LE: loop exit
PB: predicated region body
PF: predicated region fallthrough
CT: control target
= control target key end

     0   :  { %vm31_vm0 = vcmask 1043456   ;;  %vm24_vm1 = vcmask 31744   ;;  %s393_s0 = inlined_call_operand.vmem [shape: f32[16,4], index: 0, kind: input, shape index: {}]   ;;  %s394_s1 = inlined_call_operand.vmem [shape: f32[4,32], index: 1, kind: input, shape index: {}]   ;;  %s395_s2 = inlined_call_operand.vmem [shape: f32[2,32], index: 2, kind: input, shape index: {}]   ;;  %s396_s3 = inlined_call_operand.vmem [shape: f32[32,256], index: 3, kind: input, shape index: {}]   ;;  %s397_s4 = inlined_call_operand.vmem [shape: f32[1,256], index: 4, kind: input, shape index: {}]   ;;  %s398_s5 = inlined_call_operand.hbm [shape: f32[16,256], index: 5, kind: output, shape index: {}]  }
   0x1   :  { %v23_v0 = vld [vmem:[%s394_s1] sm:$0xf]  ;;  %v22_v2 = vld [vmem:[%s393_s0 + $0x8] sm:$0xff]  ;;  %v129_v4 = vld [vmem:[%s396_s3 + $0x18] sm:$0xff] }
   0x2   :  { %v21_v1 = vld [vmem:[%s393_s0] sm:$0xff]  ;;  %260 = vmatprep.subr.msk.mxu0 %vm31_vm0, %v23_v0  ;;  %v127_v3 = vld [vmem:[%s396_s3 + $0x8] sm:$0xff] }
   0x3   :  { %262 = vmatprep.mubr.msk.f32.mxu0 %vm24_vm1, %v21_v1 }
   0x4   :  { %10 = vsyncpa [#allocation3], 0  ;;  %261 = vmatpush3.msk.msra.mxu0 %vm31_vm0, %v23_v0  ;;  %v265_v5 = vpack.c.bf16 %v129_v4, %v127_v3  ;;  %v126_v6 = vld [vmem:[%s396_s3] sm:$0xff]  ;;  %v128_v7 = vld [vmem:[%s396_s3 + $0x10] sm:$0xff]  ;;  %v305_v15 = vmov 0.0   ;;  %vm146_vm2 = vcmask 261120   ;;  %v136_v26 = vlaneseq }
   0x5   :  { %263 = vmatmul.mubr.msk.f32.vlgmr.msra.gmra.mrb[0].mxu0 %vm24_vm1, %v22_v2  ;;  %v267_v8 = vpack.c.bf16 %v128_v7, %v126_v6  ;;  %v131_v9 = vld [vmem:[%s396_s3 + $0x28] sm:$0xff]  ;;  %v133_v10 = vld [vmem:[%s396_s3 + $0x38] sm:$0xff]  ;;  %v130_v12 = vld [vmem:[%s396_s3 + $0x20] sm:$0xff]  ;;  %223 = vmatprep.mubr.f32.mxu1 %v305_v15 }
   0x6   :  { %273 = vmatprep.subr.bf16.mxu1 %v265_v5  ;;  %266 = vmatprep.subr.bf16.mxu0 %v265_v5  ;;  %v269_v11 = vpack.c.bf16 %v133_v10, %v131_v9  ;;  %v132_v13 = vld [vmem:[%s396_s3 + $0x30] sm:$0xff]  ;;  %v253_v16 = vld [vmem:[%s395_s2] ss:$0 sm:$0xff]  ;;  %v254_v18 = vld [vmem:[%s395_s2 + $0x1] ss:$0 sm:$0xff]  ;;  %v137_v27 = vshrl.u32 %v136_v26, 7 }
   0x7   :  { %275 = vmatpush1.bf16.msra.mxu1 %v267_v8  ;;  %268 = vmatpush1.bf16.msra.mxu0 %v267_v8  ;;  %v271_v14 = vpack.c.bf16 %v132_v13, %v130_v12  ;;  %v134_v29 = vld [vmem:[%s397_s4] sm:$0x3]  ;;  %s306_s2 = smov [#allocation2]  }
   0x8   :  { %274 = vmatprep.subr.bf16.mxu1 %v269_v11  ;;  %270 = vmatprep.subr.bf16.mxu0 %v269_v11  ;;  %v138_v28 = vsub.s32 0, %v137_v27  ;;  %v142_v30 = vsub.s32 1, %v137_v27  ;;  %s239_s18 = sshll.u32 %s306_s2, 4  ;;  %s240_s18 = int_to_ptr.vmem [resolvable:$true] %s239_s18 }
   0x9   :  { %217 = vmatprep.mubr.f32.mxu0 %v305_v15  ;;  %s281_s19 = scalar_lea.vmem %s240_s18, 512  ;;  %p286_p1 = scmp.lt.s32.totalorder %s240_s18, %s240_s18 }
   0xa   :  { %v139_v31 = vrot.slane %v134_v29, %v138_v28  ;;  %v143_v32 = vrot.slane %v134_v29, %v142_v30  ;;  %p282_p0 = scmp.ne.s32.totalorder %s240_s18, %s281_s19  ;;  %p287_p2 = scmp.lt.s32.totalorder %s281_s19, %s281_s19 }
   0xb   :  { %276 = vmatpush1.bf16.msra.mxu1 %v271_v14  ;;  %272 = vmatpush1.bf16.msra.mxu0 %v271_v14 }
   0xc   :  { %p288_p3 = por %p287_p2, %p286_p1 }
   0xe   :  { %p289_p4 = pnand %p288_p3, %p282_p0 }
  0xd8   :  { %v264_v17 = vpop.f32.mrb[0].mxu0 }
  0xd9   :  { %v116_v19 = vmul.f32 %v264_v17, %v253_v16  ;;  %v101_v20 = vpop.f32.mrb[1].mxu0 }
  0xda   :  { %v115_v21 = vmul.f32 %v253_v16, %v101_v20 }
  0xdb   :  { %v123_v22 = vadd.f32 %v254_v18, %v116_v19 }
  0xdc   :  { %v122_v23 = vadd.f32 %v254_v18, %v115_v21 }
  0xdd   :  { %v125_v24 = vmax.f32 %v123_v22, 0.0 }
  0xde   :  { %v124_v25 = vmax.f32 %v122_v23, 0.0 }
  0xdf   :  { %256 = vmatmul.mubr.msk.f32.vlgmr.msra.gmra.mrb[0].mxu1 %vm146_vm2, %v125_v24 }
  0xe0   :  { %255 = vmatmul.mubr.msk.f32.vlgmr.msra.gmra.mrb[2].mxu0 %vm146_vm2, %v124_v25 }
 0x1b2   :  { %v225_v33 = vpop.f32.mrb[0].mxu1 }
 0x1b3   :  { %v226_v34 = vadd.f32 %v225_v33, %v139_v31  ;;  %v219_v35 = vpop.f32.mrb[2].mxu0  ;;  %v227_v36 = vpop.f32.mrb[1].mxu1 }
 0x1b4   :  { %v220_v37 = vadd.f32 %v219_v35, %v139_v31  ;;  %v228_v38 = vadd.f32 %v227_v36, %v143_v32  ;;  %v221_v39 = vpop.f32.mrb[3].mxu0 }
 0x1b5   :  { %232 = vst [vmem:[#allocation2 + $0x10] sm:$0xff] %v226_v34  ;;  %v222_v40 = vadd.f32 %v221_v39, %v143_v32 }
 0x1b6   :  { %230 = vst [vmem:[#allocation2] sm:$0xff] %v220_v37  ;;  %233 = vst [vmem:[#allocation2 + $0x18] sm:$0xff] %v228_v38 }
 0x1b7   :  { %231 = vst [vmem:[#allocation2 + $0x8] sm:$0xff] %v222_v40 }
 0x1b8   :  { %292 = shalt.err (!%p289_p4)
}
 0x1b9   :  { %s293_s21 = scalar_lea.hbm %s398_s5, 512 }
 0x1ba   :  { %p294_p5 = scmp.ne.s32.totalorder %s398_s5, %s293_s21  ;;  %p297_p6 = scmp.lt.u32.totalorder %s293_s21, %s398_s5 }
 0x1bc   :  { %p299_p7 = pnand %p297_p6, %p294_p5 }
 0x1be   :  { %302 = shalt.err (!%p299_p7)
}
 0x1bf   :  { %s307_s26 = smov 256   ;;  %s308_s27 = smov 16  }
 0x1c0   :  { %245 = dma.vmem_to_hbm [thread:$0]  %s240_s18, 512, %s398_s5, [#allocation3], %s307_s26, %s307_s26, %s308_s27  }
 0x1c1   :  { %303 = dma.done.wait [#allocation3], 512  }
 0x1c2   :  { %304 = vsyncadd [#allocation3], 4294966784 }
 0x1c3   :  { %249 = vsyncpa [#allocation3], 1 }

</bundles_post_ra>
